<compile_context>
chip_gen: v5e
topology: v5e:2x2
jax: 0.10.0
libtpu: 0.0.40
codegen_flags: <defaults>
</compile_context>

<pallas_src>
import functools
import math

import jax
import jax.numpy as jnp
from jax.experimental import pallas as pl
from jax.experimental.pallas import tpu as pltpu

NEG_INF = -1e9  # finite so (s - m) never produces inf - inf = nan


def _round_up(x, m):
    return (x + m - 1) // m * m


# ---------------------------------------------------------------------------
# Stage 1: fused Q/K/V projection (one wide MXU matmul per token tile)
# ---------------------------------------------------------------------------
def _qkv_kernel(x_ref, w_ref, b_ref, q_ref, k_ref, v_ref, *, hidden):
    x = x_ref[...].astype(jnp.bfloat16)                     # cast in-kernel
    acc = jnp.dot(x, w_ref[...], preferred_element_type=jnp.float32)
    acc = acc + b_ref[...]                                   # (tm, 3H) f32
    q_ref[...] = acc[:, :hidden].astype(q_ref.dtype)
    k_ref[...] = acc[:, hidden:2 * hidden].astype(k_ref.dtype)
    v_ref[...] = acc[:, 2 * hidden:].astype(v_ref.dtype)


# ---------------------------------------------------------------------------
# Stage 2a: single-kv-tile attention (all heads in-block, plain softmax)
# ---------------------------------------------------------------------------
def _attn_single_kv_kernel(q_ref, k_ref, v_ref, *rest, nh, hd, has_mask):
    if has_mask:
        mask_ref, o_ref = rest
        mask = mask_ref[0]                                   # (1, tk) f32
    else:
        (o_ref,) = rest

    outs = []
    for h in range(nh):
        sl = slice(h * hd, (h + 1) * hd)
        q = q_ref[0, :, sl]                                  # (tq, hd) bf16
        k = k_ref[0, :, sl]                                  # (tk, hd) bf16
        v = v_ref[0, :, sl]                                  # (tk, hd) bf16
        s = jax.lax.dot_general(q, k, (((1,), (1,)), ((), ())),
                                preferred_element_type=jnp.float32)  # (tq, tk)
        if has_mask:
            s = s + mask
        m = jnp.max(s, axis=-1, keepdims=True)
        p = jnp.exp(s - m)
        l = jnp.sum(p, axis=-1, keepdims=True)
        ctx = jnp.dot(p.astype(v.dtype), v,
                      preferred_element_type=jnp.float32)    # (tq, hd) f32
        outs.append(ctx * pl.reciprocal(l, approx=True))

    o_ref[0] = jnp.concatenate(outs, axis=-1).astype(o_ref.dtype)


# ---------------------------------------------------------------------------
# Stage 2b: flash-style attention for long sequences (online softmax)
# ---------------------------------------------------------------------------
def _attn_flash_kernel(q_ref, k_ref, v_ref, *rest, nh, hd, has_mask):
    if has_mask:
        mask_ref, o_ref, m_sc, l_sc, acc_sc = rest
    else:
        o_ref, m_sc, l_sc, acc_sc = rest

    kj = pl.program_id(2)

    @pl.when(kj == 0)
    def _():
        m_sc[...] = jnp.full_like(m_sc, -jnp.inf)
        l_sc[...] = jnp.zeros_like(l_sc)
        acc_sc[...] = jnp.zeros_like(acc_sc)

    for h in range(nh):
        sl = slice(h * hd, (h + 1) * hd)
        q = q_ref[0, :, sl]
        k = k_ref[0, :, sl]
        v = v_ref[0, :, sl]
        s = jax.lax.dot_general(q, k, (((1,), (1,)), ((), ())),
                                preferred_element_type=jnp.float32)
        if has_mask:
            s = s + mask_ref[0]                              # (1, tk) broadcast

        m_prev = m_sc[h]                                     # (tq, 1)
        m_new = jnp.maximum(m_prev, jnp.max(s, axis=-1, keepdims=True))
        alpha = jnp.exp(m_prev - m_new)
        p = jnp.exp(s - m_new)
        l_sc[h] = alpha * l_sc[h] + jnp.sum(p, axis=-1, keepdims=True)
        acc_sc[:, sl] = alpha * acc_sc[:, sl] + jnp.dot(
            p.astype(v.dtype), v, preferred_element_type=jnp.float32)
        m_sc[h] = m_new

    @pl.when(kj == pl.num_programs(2) - 1)
    def _():
        outs = []
        for h in range(nh):
            sl = slice(h * hd, (h + 1) * hd)
            outs.append(acc_sc[:, sl] * pl.reciprocal(l_sc[h], approx=True))
        o_ref[0] = jnp.concatenate(outs, axis=-1).astype(o_ref.dtype)


# ---------------------------------------------------------------------------
# Parameter preparation (done ONCE, outside the jitted forward)
# ---------------------------------------------------------------------------
def prepare_params(params, *, num_heads):
    """Fuse Q/K/V weights into one (H, 3H) bf16 matrix with 1/sqrt(hd) folded
    into the Q part; biases into one (1, 3H) f32 row."""
    H = params["wq"].shape[0]
    if H % num_heads:
        raise ValueError("hidden_size must be divisible by num_attention_heads")
    scale = 1.0 / math.sqrt(H // num_heads)
    w = jnp.concatenate(
        [params["wq"].T * scale, params["wk"].T, params["wv"].T], axis=1)
    b = jnp.concatenate(
        [params["bq"] * scale, params["bk"], params["bv"]]).reshape(1, 3 * H)
    return {"w_qkv": w.astype(jnp.bfloat16), "b_qkv": b.astype(jnp.float32)}


# ---------------------------------------------------------------------------
# Forward
# ---------------------------------------------------------------------------
def bert_self_attention(hidden_states, prepared, attention_mask=None, *,
                        num_heads):
    """hidden_states: [B, S, H] -> context_layer: [B, S, H].

    `prepared` comes from `prepare_params`.  attention_mask (optional) is an
    HF-style additive key-wise mask broadcastable to (B, 1, 1, S) with finite
    values (0 = keep, large negative = masked).
    """
    B, S, H = hidden_states.shape
    if H % num_heads:
        raise ValueError("hidden_size must be divisible by num_attention_heads")
    hd = H // num_heads

    # --- sequence padding (keep blocks (8,128)-friendly) ---
    S_pad = _round_up(S, 8) if S <= 128 else _round_up(S, 128)

    x = hidden_states
    if S_pad != S:
        x = jnp.pad(x, ((0, 0), (0, S_pad - S), (0, 0)))

    has_mask = (attention_mask is not None) or (S_pad != S)
    if has_mask:
        kv_mask = jnp.zeros((B, 1, S_pad), jnp.float32)
        if attention_mask is not None:
            am = jnp.asarray(attention_mask, jnp.float32)
            am = jnp.broadcast_to(am, (B, 1, 1, S)).reshape(B, 1, S)
            kv_mask = kv_mask.at[:, :, :S].add(am)
        if S_pad != S:
            kv_mask = kv_mask.at[:, :, S:].set(NEG_INF)

    # --- stage 1: fused QKV projection over token tiles ---
    T = B * S_pad
    tm = T
    for cand in (512, 256, 128):
        if T % cand == 0:
            tm = cand
            break

    x2 = x.reshape(T, H)  # original dtype; cast to bf16 inside the kernel

    q, k, v = pl.pallas_call(
        functools.partial(_qkv_kernel, hidden=H),
        out_shape=tuple(jax.ShapeDtypeStruct((T, H), jnp.bfloat16)
                        for _ in range(3)),
        grid_spec=pltpu.PrefetchScalarGridSpec(
            num_scalar_prefetch=0,
            grid=(T // tm,),
            in_specs=[
                pl.BlockSpec((tm, H), lambda i: (i, 0)),
                pl.BlockSpec((H, 3 * H), lambda i: (0, 0)),   # resident weight
                pl.BlockSpec((1, 3 * H), lambda i: (0, 0)),    # resident bias
            ],
            out_specs=[pl.BlockSpec((tm, H), lambda i: (i, 0))] * 3,
        ),
        compiler_params=pltpu.CompilerParams(
            dimension_semantics=("parallel",)),
    )(x2, prepared["w_qkv"], prepared["b_qkv"])

    # free reshapes only -- no head transposes
    qh = q.reshape(B, S_pad, H)
    kh = k.reshape(B, S_pad, H)
    vh = v.reshape(B, S_pad, H)

    # --- stage 2: attention, heads carried inside the block ---
    # TODO(synk): attention-prob dropout is identity at inference; head_mask
    # and output_attentions=True (returning probs) are not implemented.
    single_kv = S_pad <= 1024

    def pick_tile(n, cands):
        for c in cands:
            if n % c == 0:
                return c
        return n

    if single_kv:
        tq = pick_tile(S_pad, (256, 128))
        kernel = functools.partial(_attn_single_kv_kernel,
                                   nh=num_heads, hd=hd, has_mask=has_mask)
        in_specs = [
            pl.BlockSpec((1, tq, H), lambda b, i: (b, i, 0)),
            pl.BlockSpec((1, S_pad, H), lambda b, i: (b, 0, 0)),
            pl.BlockSpec((1, S_pad, H), lambda b, i: (b, 0, 0)),
        ]
        operands = [qh, kh, vh]
        if has_mask:
            in_specs.append(pl.BlockSpec((1, 1, S_pad), lambda b, i: (b, 0, 0)))
            operands.append(kv_mask)
        ctx = pl.pallas_call(
            kernel,
            out_shape=jax.ShapeDtypeStruct((B, S_pad, H), jnp.bfloat16),
            grid_spec=pltpu.PrefetchScalarGridSpec(
                num_scalar_prefetch=0,
                grid=(B, S_pad // tq),
                in_specs=in_specs,
                out_specs=pl.BlockSpec((1, tq, H), lambda b, i: (b, i, 0)),
            ),
            compiler_params=pltpu.CompilerParams(
                dimension_semantics=("parallel", "parallel")),
        )(*operands)
    else:
        tq = pick_tile(S_pad, (256, 128))
        tk = pick_tile(S_pad, (512, 256, 128))
        kernel = functools.partial(_attn_flash_kernel,
                                   nh=num_heads, hd=hd, has_mask=has_mask)
        in_specs = [
            pl.BlockSpec((1, tq, H), lambda b, i, j: (b, i, 0)),
            pl.BlockSpec((1, tk, H), lambda b, i, j: (b, j, 0)),
            pl.BlockSpec((1, tk, H), lambda b, i, j: (b, j, 0)),
        ]
        operands = [qh, kh, vh]
        if has_mask:
            in_specs.append(
                pl.BlockSpec((1, 1, tk), lambda b, i, j: (b, 0, j)))
            operands.append(kv_mask)
        ctx = pl.pallas_call(
            kernel,
            out_shape=jax.ShapeDtypeStruct((B, S_pad, H), jnp.bfloat16),
            grid_spec=pltpu.PrefetchScalarGridSpec(
                num_scalar_prefetch=0,
                grid=(B, S_pad // tq, S_pad // tk),
                in_specs=in_specs,
                out_specs=pl.BlockSpec((1, tq, H), lambda b, i, j: (b, i, 0)),
                scratch_shapes=[
                    pltpu.VMEM((num_heads, tq, 1), jnp.float32),  # running max
                    pltpu.VMEM((num_heads, tq, 1), jnp.float32),  # running denom
                    pltpu.VMEM((tq, H), jnp.float32),             # accumulator
                ],
            ),
            compiler_params=pltpu.CompilerParams(
                dimension_semantics=("parallel", "parallel", "arbitrary")),
        )(*operands)

    # drop sequence padding, cast to the caller's dtype
    return ctx[:, :S, :].astype(hidden_states.dtype)


# ---------------------------------------------------------------------------
# Params / reference / test
# ---------------------------------------------------------------------------
def init_params(key, hidden):
    ks = jax.random.split(key, 6)
    s = 0.02
    return {
        "wq": s * jax.random.normal(ks[0], (hidden, hidden), jnp.float32),
        "bq": s * jax.random.normal(ks[1], (hidden,), jnp.float32),
        "wk": s * jax.random.normal(ks[2], (hidden, hidden), jnp.float32),
        "bk": s * jax.random.normal(ks[3], (hidden,), jnp.float32),
        "wv": s * jax.random.normal(ks[4], (hidden, hidden), jnp.float32),
        "bv": s * jax.random.normal(ks[5], (hidden,), jnp.float32),
    }


def _reference(hidden_states, params, attention_mask, num_heads):
    """Pure-JAX f32 reference mirroring the PyTorch forward."""
    B, S, H = hidden_states.shape
    hd = H // num_heads

    def lin(w, b):
        return hidden_states @ w.T + b

    q = lin(params["wq"], params["bq"])
    k = lin(params["wk"], params["bk"])
    v = lin(params["wv"], params["bv"])

    def split(t):
        return t.reshape(B, S, num_heads, hd).transpose(0, 2, 1, 3)

    q, k, v = split(q), split(k), split(v)
    s = jnp.einsum("bhqd,bhkd->bhqk", q, k) / math.sqrt(hd)
    if attention_mask is not None:
        s = s + attention_mask
    p = jax.nn.softmax(s, axis=-1)
    ctx = jnp.einsum("bhqk,bhkd->bhqd", p, v)
    return ctx.transpose(0, 2, 1, 3).reshape(B, S, H)


if __name__ == "__main__":
    batch, seq, hidden, heads = 2, 8, 128, 4

    key = jax.random.PRNGKey(0)
    kx, kp = jax.random.split(key)
    x = jax.random.normal(kx, (batch, seq, hidden), jnp.float32)
    params = init_params(kp, hidden)

    prepped = prepare_params(params, num_heads=heads)  # once, outside jit
    fn = jax.jit(functools.partial(bert_self_attention, num_heads=heads))
    out = jax.block_until_ready(fn(x, prepped))

    ref = _reference(x, params, None, heads)
    assert out.shape == (batch, seq, hidden), out.shape
    max_err = float(jnp.max(jnp.abs(out - ref)))
    # bf16 MXU inputs + bf16 context output -> looser tolerance than pure f32.
    assert jnp.allclose(out, ref, atol=2e-2, rtol=2e-2), max_err

    print("KERNEL_OK")
</pallas_src>

<mosaic_0001>
module attributes {stable_mosaic.version = 11 : i64} {
  func.func @_qkv_kernel(%arg0: i32, %arg1: memref<16x128xf32, #tpu.memory_space<vmem>>, %arg2: memref<128x384xbf16, #tpu.memory_space<vmem>>, %arg3: memref<1x384xf32, #tpu.memory_space<vmem>>, %arg4: memref<16x128xbf16, #tpu.memory_space<vmem>>, %arg5: memref<16x128xbf16, #tpu.memory_space<vmem>>, %arg6: memref<16x128xbf16, #tpu.memory_space<vmem>>) attributes {dimension_semantics = [#tpu.dimension_semantics<parallel>], iteration_bounds = array<i64: 1>, scalar_prefetch = 0 : i64, scratch_operands = 0 : i64, tpu.core_type = #tpu.core_type<tc>, window_params = [{transform_indices = @transform_0, window_bounds = array<i64: 16, 128>}, {pipeline_mode = #tpu.pipeline_mode<synchronous>, transform_indices = @transform_1, window_bounds = array<i64: 128, 384>}, {pipeline_mode = #tpu.pipeline_mode<synchronous>, transform_indices = @transform_2, window_bounds = array<i64: 1, 384>}, {transform_indices = @transform_3, window_bounds = array<i64: 16, 128>}, {transform_indices = @transform_4, window_bounds = array<i64: 16, 128>}, {transform_indices = @transform_5, window_bounds = array<i64: 16, 128>}]} {
    %c0 = arith.constant 0 : index
    %c0_0 = arith.constant 0 : index
    %0 = vector.load %arg1[%c0, %c0_0] : memref<16x128xf32, #tpu.memory_space<vmem>>, vector<16x128xf32>
    %1 = arith.truncf %0 : vector<16x128xf32> to vector<16x128xbf16>
    %c0_1 = arith.constant 0 : index
    %c0_2 = arith.constant 0 : index
    %2 = vector.load %arg2[%c0_1, %c0_2] : memref<128x384xbf16, #tpu.memory_space<vmem>>, vector<128x384xbf16>
    %cst = arith.constant dense<0.000000e+00> : vector<16x384xf32>
    %3 = tpu.matmul %1, %2, %cst {dimension_numbers = #tpu.dot_dimension_numbers<[1], [0], [0], [1], [0, 0, 1, 1], [], []>} : vector<16x128xbf16>, vector<128x384xbf16>, vector<16x384xf32> -> vector<16x384xf32>
    %c0_3 = arith.constant 0 : index
    %c0_4 = arith.constant 0 : index
    %4 = vector.load %arg3[%c0_3, %c0_4] : memref<1x384xf32, #tpu.memory_space<vmem>>, vector<1x384xf32>
    %5 = vector.broadcast %4 : vector<1x384xf32> to vector<16x384xf32>
    %6 = arith.addf %3, %5 : vector<16x384xf32>
    %7 = vector.extract_strided_slice %6 {offsets = [0, 0], sizes = [16, 128], strides = [1, 1]} : vector<16x384xf32> to vector<16x128xf32>
    %8 = arith.truncf %7 : vector<16x128xf32> to vector<16x128xbf16>
    %c0_5 = arith.constant 0 : index
    %c0_6 = arith.constant 0 : index
    %9 = vector.load %arg4[%c0_5, %c0_6] : memref<16x128xbf16, #tpu.memory_space<vmem>>, vector<16x128xbf16>
    tpu.vector_store %arg4[%c0_5, %c0_6], %8 {strides = array<i32>} : memref<16x128xbf16, #tpu.memory_space<vmem>>, vector<16x128xbf16>,
    %10 = vector.extract_strided_slice %6 {offsets = [0, 128], sizes = [16, 128], strides = [1, 1]} : vector<16x384xf32> to vector<16x128xf32>
    %11 = arith.truncf %10 : vector<16x128xf32> to vector<16x128xbf16>
    %c0_7 = arith.constant 0 : index
    %c0_8 = arith.constant 0 : index
    %12 = vector.load %arg5[%c0_7, %c0_8] : memref<16x128xbf16, #tpu.memory_space<vmem>>, vector<16x128xbf16>
    tpu.vector_store %arg5[%c0_7, %c0_8], %11 {strides = array<i32>} : memref<16x128xbf16, #tpu.memory_space<vmem>>, vector<16x128xbf16>,
    %13 = vector.extract_strided_slice %6 {offsets = [0, 256], sizes = [16, 128], strides = [1, 1]} : vector<16x384xf32> to vector<16x128xf32>
    %14 = arith.truncf %13 : vector<16x128xf32> to vector<16x128xbf16>
    %c0_9 = arith.constant 0 : index
    %c0_10 = arith.constant 0 : index
    %15 = vector.load %arg6[%c0_9, %c0_10] : memref<16x128xbf16, #tpu.memory_space<vmem>>, vector<16x128xbf16>
    tpu.vector_store %arg6[%c0_9, %c0_10], %14 {strides = array<i32>} : memref<16x128xbf16, #tpu.memory_space<vmem>>, vector<16x128xbf16>,
    return
  }
  func.func @transform_0(%arg0: i32) -> (i32, i32) {
    %c0_i32 = arith.constant 0 : i32
    %c0_i32_0 = arith.constant 0 : i32
    return %arg0, %c0_i32 : i32, i32
  }
  func.func @transform_1(%arg0: i32) -> (i32, i32) {
    %c0_i32 = arith.constant 0 : i32
    %c0_i32_0 = arith.constant 0 : i32
    %c0_i32_1 = arith.constant 0 : i32
    return %c0_i32, %c0_i32_0 : i32, i32
  }
  func.func @transform_2(%arg0: i32) -> (i32, i32) {
    %c0_i32 = arith.constant 0 : i32
    %c0_i32_0 = arith.constant 0 : i32
    %c0_i32_1 = arith.constant 0 : i32
    return %c0_i32, %c0_i32_0 : i32, i32
  }
  func.func @transform_3(%arg0: i32) -> (i32, i32) {
    %c0_i32 = arith.constant 0 : i32
    %c0_i32_0 = arith.constant 0 : i32
    return %arg0, %c0_i32 : i32, i32
  }
  func.func @transform_4(%arg0: i32) -> (i32, i32) {
    %c0_i32 = arith.constant 0 : i32
    %c0_i32_0 = arith.constant 0 : i32
    return %arg0, %c0_i32 : i32, i32
  }
  func.func @transform_5(%arg0: i32) -> (i32, i32) {
    %c0_i32 = arith.constant 0 : i32
    %c0_i32_0 = arith.constant 0 : i32
    return %arg0, %c0_i32 : i32, i32
  }
}

module attributes {stable_mosaic.version = 11 : i64} {
  func.func @_attn_single_kv_kernel(%arg0: i32, %arg1: i32, %arg2: memref<1x8x128xbf16, #tpu.memory_space<vmem>>, %arg3: memref<1x8x128xbf16, #tpu.memory_space<vmem>>, %arg4: memref<1x8x128xbf16, #tpu.memory_space<vmem>>, %arg5: memref<1x8x128xbf16, #tpu.memory_space<vmem>>) attributes {dimension_semantics = [#tpu.dimension_semantics<parallel>, #tpu.dimension_semantics<parallel>], iteration_bounds = array<i64: 2, 1>, scalar_prefetch = 0 : i64, scratch_operands = 0 : i64, tpu.core_type = #tpu.core_type<tc>, window_params = [{transform_indices = @transform_0, window_bounds = array<i64: 1, 8, 128>}, {transform_indices = @transform_1, window_bounds = array<i64: 1, 8, 128>}, {transform_indices = @transform_2, window_bounds = array<i64: 1, 8, 128>}, {transform_indices = @transform_3, window_bounds = array<i64: 1, 8, 128>}]} {
    %c0 = arith.constant 0 : index
    %c0_0 = arith.constant 0 : index
    %c0_1 = arith.constant 0 : index
    %0 = vector.load %arg2[%c0, %c0_0, %c0_1] : memref<1x8x128xbf16, #tpu.memory_space<vmem>>, vector<1x8x32xbf16>
    %1 = vector.shape_cast %0 : vector<1x8x32xbf16> to vector<8x32xbf16>
    %c0_2 = arith.constant 0 : index
    %c0_3 = arith.constant 0 : index
    %c0_4 = arith.constant 0 : index
    %2 = vector.load %arg3[%c0_2, %c0_3, %c0_4] : memref<1x8x128xbf16, #tpu.memory_space<vmem>>, vector<1x8x32xbf16>
    %3 = vector.shape_cast %2 : vector<1x8x32xbf16> to vector<8x32xbf16>
    %c0_5 = arith.constant 0 : index
    %c0_6 = arith.constant 0 : index
    %c0_7 = arith.constant 0 : index
    %4 = vector.load %arg4[%c0_5, %c0_6, %c0_7] : memref<1x8x128xbf16, #tpu.memory_space<vmem>>, vector<1x8x32xbf16>
    %5 = vector.shape_cast %4 : vector<1x8x32xbf16> to vector<8x32xbf16>
    %cst = arith.constant dense<0.000000e+00> : vector<8x8xf32>
    %6 = tpu.matmul %1, %3, %cst {dimension_numbers = #tpu.dot_dimension_numbers<[1], [1], [0], [0], [0, 0, 1, 0], [], []>} : vector<8x32xbf16>, vector<8x32xbf16>, vector<8x8xf32> -> vector<8x8xf32>
    %cst_8 = arith.constant dense<0xFF800000> : vector<8xf32>
    %7 = vector.multi_reduction <maximumf>, %6, %cst_8 [1] : vector<8x8xf32> to vector<8xf32>
    %8 = vector.shape_cast %7 : vector<8xf32> to vector<8x1xf32>
    %9 = vector.broadcast %8 : vector<8x1xf32> to vector<8x8xf32>
    %10 = arith.subf %6, %9 : vector<8x8xf32>
    %11 = math.exp %10 : vector<8x8xf32>
    %cst_9 = arith.constant dense<0.000000e+00> : vector<8xf32>
    %12 = vector.multi_reduction <add>, %11, %cst_9 [1] : vector<8x8xf32> to vector<8xf32>
    %13 = vector.shape_cast %12 : vector<8xf32> to vector<8x1xf32>
    %14 = arith.truncf %11 : vector<8x8xf32> to vector<8x8xbf16>
    %cst_10 = arith.constant dense<0.000000e+00> : vector<8x32xf32>
    %15 = tpu.matmul %14, %5, %cst_10 {dimension_numbers = #tpu.dot_dimension_numbers<[1], [0], [0], [1], [0, 0, 1, 1], [], []>} : vector<8x8xbf16>, vector<8x32xbf16>, vector<8x32xf32> -> vector<8x32xf32>
    %16 = tpu.reciprocal %13 {approx = true} : vector<8x1xf32> -> vector<8x1xf32>
    %17 = vector.broadcast %16 : vector<8x1xf32> to vector<8x32xf32>
    %18 = arith.mulf %15, %17 : vector<8x32xf32>
    %c0_11 = arith.constant 0 : index
    %c0_12 = arith.constant 0 : index
    %c32 = arith.constant 32 : index
    %19 = vector.load %arg2[%c0_11, %c0_12, %c32] : memref<1x8x128xbf16, #tpu.memory_space<vmem>>, vector<1x8x32xbf16>
    %20 = vector.shape_cast %19 : vector<1x8x32xbf16> to vector<8x32xbf16>
    %c0_13 = arith.constant 0 : index
    %c0_14 = arith.constant 0 : index
    %c32_15 = arith.constant 32 : index
    %21 = vector.load %arg3[%c0_13, %c0_14, %c32_15] : memref<1x8x128xbf16, #tpu.memory_space<vmem>>, vector<1x8x32xbf16>
    %22 = vector.shape_cast %21 : vector<1x8x32xbf16> to vector<8x32xbf16>
    %c0_16 = arith.constant 0 : index
    %c0_17 = arith.constant 0 : index
    %c32_18 = arith.constant 32 : index
    %23 = vector.load %arg4[%c0_16, %c0_17, %c32_18] : memref<1x8x128xbf16, #tpu.memory_space<vmem>>, vector<1x8x32xbf16>
    %24 = vector.shape_cast %23 : vector<1x8x32xbf16> to vector<8x32xbf16>
    %cst_19 = arith.constant dense<0.000000e+00> : vector<8x8xf32>
    %25 = tpu.matmul %20, %22, %cst_19 {dimension_numbers = #tpu.dot_dimension_numbers<[1], [1], [0], [0], [0, 0, 1, 0], [], []>} : vector<8x32xbf16>, vector<8x32xbf16>, vector<8x8xf32> -> vector<8x8xf32>
    %cst_20 = arith.constant dense<0xFF800000> : vector<8xf32>
    %26 = vector.multi_reduction <maximumf>, %25, %cst_20 [1] : vector<8x8xf32> to vector<8xf32>
    %27 = vector.shape_cast %26 : vector<8xf32> to vector<8x1xf32>
    %28 = vector.broadcast %27 : vector<8x1xf32> to vector<8x8xf32>
    %29 = arith.subf %25, %28 : vector<8x8xf32>
    %30 = math.exp %29 : vector<8x8xf32>
    %cst_21 = arith.constant dense<0.000000e+00> : vector<8xf32>
    %31 = vector.multi_reduction <add>, %30, %cst_21 [1] : vector<8x8xf32> to vector<8xf32>
    %32 = vector.shape_cast %31 : vector<8xf32> to vector<8x1xf32>
    %33 = arith.truncf %30 : vector<8x8xf32> to vector<8x8xbf16>
    %cst_22 = arith.constant dense<0.000000e+00> : vector<8x32xf32>
    %34 = tpu.matmul %33, %24, %cst_22 {dimension_numbers = #tpu.dot_dimension_numbers<[1], [0], [0], [1], [0, 0, 1, 1], [], []>} : vector<8x8xbf16>, vector<8x32xbf16>, vector<8x32xf32> -> vector<8x32xf32>
    %35 = tpu.reciprocal %32 {approx = true} : vector<8x1xf32> -> vector<8x1xf32>
    %36 = vector.broadcast %35 : vector<8x1xf32> to vector<8x32xf32>
    %37 = arith.mulf %34, %36 : vector<8x32xf32>
    %c0_23 = arith.constant 0 : index
    %c0_24 = arith.constant 0 : index
    %c64 = arith.constant 64 : index
    %38 = vector.load %arg2[%c0_23, %c0_24, %c64] : memref<1x8x128xbf16, #tpu.memory_space<vmem>>, vector<1x8x32xbf16>
    %39 = vector.shape_cast %38 : vector<1x8x32xbf16> to vector<8x32xbf16>
    %c0_25 = arith.constant 0 : index
    %c0_26 = arith.constant 0 : index
    %c64_27 = arith.constant 64 : index
    %40 = vector.load %arg3[%c0_25, %c0_26, %c64_27] : memref<1x8x128xbf16, #tpu.memory_space<vmem>>, vector<1x8x32xbf16>
    %41 = vector.shape_cast %40 : vector<1x8x32xbf16> to vector<8x32xbf16>
    %c0_28 = arith.constant 0 : index
    %c0_29 = arith.constant 0 : index
    %c64_30 = arith.constant 64 : index
    %42 = vector.load %arg4[%c0_28, %c0_29, %c64_30] : memref<1x8x128xbf16, #tpu.memory_space<vmem>>, vector<1x8x32xbf16>
    %43 = vector.shape_cast %42 : vector<1x8x32xbf16> to vector<8x32xbf16>
    %cst_31 = arith.constant dense<0.000000e+00> : vector<8x8xf32>
    %44 = tpu.matmul %39, %41, %cst_31 {dimension_numbers = #tpu.dot_dimension_numbers<[1], [1], [0], [0], [0, 0, 1, 0], [], []>} : vector<8x32xbf16>, vector<8x32xbf16>, vector<8x8xf32> -> vector<8x8xf32>
    %cst_32 = arith.constant dense<0xFF800000> : vector<8xf32>
    %45 = vector.multi_reduction <maximumf>, %44, %cst_32 [1] : vector<8x8xf32> to vector<8xf32>
    %46 = vector.shape_cast %45 : vector<8xf32> to vector<8x1xf32>
    %47 = vector.broadcast %46 : vector<8x1xf32> to vector<8x8xf32>
    %48 = arith.subf %44, %47 : vector<8x8xf32>
    %49 = math.exp %48 : vector<8x8xf32>
    %cst_33 = arith.constant dense<0.000000e+00> : vector<8xf32>
    %50 = vector.multi_reduction <add>, %49, %cst_33 [1] : vector<8x8xf32> to vector<8xf32>
    %51 = vector.shape_cast %50 : vector<8xf32> to vector<8x1xf32>
    %52 = arith.truncf %49 : vector<8x8xf32> to vector<8x8xbf16>
    %cst_34 = arith.constant dense<0.000000e+00> : vector<8x32xf32>
    %53 = tpu.matmul %52, %43, %cst_34 {dimension_numbers = #tpu.dot_dimension_numbers<[1], [0], [0], [1], [0, 0, 1, 1], [], []>} : vector<8x8xbf16>, vector<8x32xbf16>, vector<8x32xf32> -> vector<8x32xf32>
    %54 = tpu.reciprocal %51 {approx = true} : vector<8x1xf32> -> vector<8x1xf32>
    %55 = vector.broadcast %54 : vector<8x1xf32> to vector<8x32xf32>
    %56 = arith.mulf %53, %55 : vector<8x32xf32>
    %c0_35 = arith.constant 0 : index
    %c0_36 = arith.constant 0 : index
    %c96 = arith.constant 96 : index
    %57 = vector.load %arg2[%c0_35, %c0_36, %c96] : memref<1x8x128xbf16, #tpu.memory_space<vmem>>, vector<1x8x32xbf16>
    %58 = vector.shape_cast %57 : vector<1x8x32xbf16> to vector<8x32xbf16>
    %c0_37 = arith.constant 0 : index
    %c0_38 = arith.constant 0 : index
    %c96_39 = arith.constant 96 : index
    %59 = vector.load %arg3[%c0_37, %c0_38, %c96_39] : memref<1x8x128xbf16, #tpu.memory_space<vmem>>, vector<1x8x32xbf16>
    %60 = vector.shape_cast %59 : vector<1x8x32xbf16> to vector<8x32xbf16>
    %c0_40 = arith.constant 0 : index
    %c0_41 = arith.constant 0 : index
    %c96_42 = arith.constant 96 : index
    %61 = vector.load %arg4[%c0_40, %c0_41, %c96_42] : memref<1x8x128xbf16, #tpu.memory_space<vmem>>, vector<1x8x32xbf16>
    %62 = vector.shape_cast %61 : vector<1x8x32xbf16> to vector<8x32xbf16>
    %cst_43 = arith.constant dense<0.000000e+00> : vector<8x8xf32>
    %63 = tpu.matmul %58, %60, %cst_43 {dimension_numbers = #tpu.dot_dimension_numbers<[1], [1], [0], [0], [0, 0, 1, 0], [], []>} : vector<8x32xbf16>, vector<8x32xbf16>, vector<8x8xf32> -> vector<8x8xf32>
    %cst_44 = arith.constant dense<0xFF800000> : vector<8xf32>
    %64 = vector.multi_reduction <maximumf>, %63, %cst_44 [1] : vector<8x8xf32> to vector<8xf32>
    %65 = vector.shape_cast %64 : vector<8xf32> to vector<8x1xf32>
    %66 = vector.broadcast %65 : vector<8x1xf32> to vector<8x8xf32>
    %67 = arith.subf %63, %66 : vector<8x8xf32>
    %68 = math.exp %67 : vector<8x8xf32>
    %cst_45 = arith.constant dense<0.000000e+00> : vector<8xf32>
    %69 = vector.multi_reduction <add>, %68, %cst_45 [1] : vector<8x8xf32> to vector<8xf32>
    %70 = vector.shape_cast %69 : vector<8xf32> to vector<8x1xf32>
    %71 = arith.truncf %68 : vector<8x8xf32> to vector<8x8xbf16>
    %cst_46 = arith.constant dense<0.000000e+00> : vector<8x32xf32>
    %72 = tpu.matmul %71, %62, %cst_46 {dimension_numbers = #tpu.dot_dimension_numbers<[1], [0], [0], [1], [0, 0, 1, 1], [], []>} : vector<8x8xbf16>, vector<8x32xbf16>, vector<8x32xf32> -> vector<8x32xf32>
    %73 = tpu.reciprocal %70 {approx = true} : vector<8x1xf32> -> vector<8x1xf32>
    %74 = vector.broadcast %73 : vector<8x1xf32> to vector<8x32xf32>
    %75 = arith.mulf %72, %74 : vector<8x32xf32>
    %76 = tpu.concatenate %18, %37, %56, %75 in 1 : vector<8x32xf32>, vector<8x32xf32>, vector<8x32xf32>, vector<8x32xf32> -> vector<8x128xf32>
    %77 = arith.truncf %76 : vector<8x128xf32> to vector<8x128xbf16>
    %c0_47 = arith.constant 0 : index
    %c0_48 = arith.constant 0 : index
    %c0_49 = arith.constant 0 : index
    %78 = vector.load %arg5[%c0_47, %c0_48, %c0_49] : memref<1x8x128xbf16, #tpu.memory_space<vmem>>, vector<1x8x128xbf16>
    %79 = vector.shape_cast %78 : vector<1x8x128xbf16> to vector<8x128xbf16>
    %80 = vector.shape_cast %77 : vector<8x128xbf16> to vector<1x8x128xbf16>
    tpu.vector_store %arg5[%c0_47, %c0_48, %c0_49], %80 {strides = array<i32>} : memref<1x8x128xbf16, #tpu.memory_space<vmem>>, vector<1x8x128xbf16>,
    return
  }
  func.func @transform_0(%arg0: i32, %arg1: i32) -> (i32, i32, i32) {
    %c0_i32 = arith.constant 0 : i32
    %c0_i32_0 = arith.constant 0 : i32
    return %arg0, %arg1, %c0_i32 : i32, i32, i32
  }
  func.func @transform_1(%arg0: i32, %arg1: i32) -> (i32, i32, i32) {
    %c0_i32 = arith.constant 0 : i32
    %c0_i32_0 = arith.constant 0 : i32
    %c0_i32_1 = arith.constant 0 : i32
    return %arg0, %c0_i32, %c0_i32_0 : i32, i32, i32
  }
  func.func @transform_2(%arg0: i32, %arg1: i32) -> (i32, i32, i32) {
    %c0_i32 = arith.constant 0 : i32
    %c0_i32_0 = arith.constant 0 : i32
    %c0_i32_1 = arith.constant 0 : i32
    return %arg0, %c0_i32, %c0_i32_0 : i32, i32, i32
  }
  func.func @transform_3(%arg0: i32, %arg1: i32) -> (i32, i32, i32) {
    %c0_i32 = arith.constant 0 : i32
    %c0_i32_0 = arith.constant 0 : i32
    return %arg0, %arg1, %c0_i32 : i32, i32, i32
  }
}

</mosaic_0001>

<bundles_post_ra>
// kernel: bert_self_attention.2
= control target key start
LH: loop header
LB: loop body
LE: loop exit
PB: predicated region body
PF: predicated region fallthrough
CT: control target
= control target key end

     0   :  { %11 = vsyncpa [#allocation3], 0  ;;  %s574_s0 = inlined_call_operand.hbm [shape: f32[16,128], index: 0, kind: input, shape index: {}]   ;;  %s575_s1 = inlined_call_operand.hbm [shape: bf16[128,384], index: 1, kind: input, shape index: {}]   ;;  %s576_s2 = inlined_call_operand.hbm [shape: f32[1,384], index: 2, kind: input, shape index: {}]   ;;  %s577_s3 = inlined_call_operand.vmem [shape: bf16[16,128], index: 3, kind: output, shape index: {0}]   ;;  %s578_s4 = inlined_call_operand.vmem [shape: bf16[16,128], index: 4, kind: output, shape index: {1}]   ;;  %s579_s5 = inlined_call_operand.vmem [shape: bf16[16,128], index: 5, kind: output, shape index: {2}]  }
   0x1   :  { %12 = vsyncpa [#allocation5], 0  ;;  %s30_s20 = sshll.u32 %s575_s1, 4  ;;  %s519_s21 = smov [#allocation4]   ;;  %s31_s20 = int_to_ptr.hbm [resolvable:$true] %s30_s20 }
   0x2   :  { %s32_s22 = sshll.u32 %s519_s21, 4  ;;  %s17_s25 = sshll.u32 %s574_s0, 4  ;;  %s33_s22 = int_to_ptr.vmem [resolvable:$true] %s32_s22  ;;  %s18_s25 = int_to_ptr.hbm [resolvable:$true] %s17_s25 }
   0x3   :  { %s520_s26 = smov 192   ;;  %s521_s27 = smov 12  }
   0x4   :  { %38 = dma.hbm_to_vmem [thread:$0]  %s31_s20, 3072, %s33_s22, [#allocation5], %s520_s26, %s520_s26, %s521_s27  }
   0x5   :  { %s522_s28 = smov [#allocation2]   ;;  %s523_s30 = smov 128  }
   0x6   :  { %s19_s29 = sshll.u32 %s522_s28, 4  ;;  %s524_s6 = smov 8   ;;  %s20_s29 = int_to_ptr.vmem [resolvable:$true] %s19_s29 }
   0x7   :  { %25 = dma.hbm_to_vmem [thread:$0]  %s18_s25, 256, %s20_s29, [#allocation3], %s523_s30, %s523_s30, %s524_s6  }
   0x8   :  { %s44_s8 = sshll.u32 %s576_s2, 4  ;;  %s525_s9 = smov [#allocation6]   ;;  %s45_s8 = int_to_ptr.hbm [resolvable:$true] %s44_s8 }
   0x9   :  { %s46_s10 = sshll.u32 %s525_s9, 4  ;;  %s47_s10 = int_to_ptr.vmem [resolvable:$true] %s46_s10 }
   0xa   :  { %49 = dma.hbm_to_vmem [thread:$0]  %s45_s8, 48, %s47_s10, [#allocation5]  }
   0xb   :  { %515 = dma.done.wait [#allocation3], 256  }
   0xc   :  { %516 = vsyncadd [#allocation3], 4294967040 }
   0xd   :  { %517 = dma.done.wait [#allocation5], 3120  }
   0xe   :  { %518 = vsyncadd [#allocation5], 4294964176  ;;  %v387_v0 = vld [vmem:[#allocation4 + $0xa8] sm:$0xf]  ;;  %v419_v1 = vld [vmem:[#allocation4 + $0xb0] sm:$0xf0] }
   0xf   :  { %v418_v2 = vld [vmem:[#allocation4 + $0xac] sm:$0xf]  ;;  %v388_v3 = vor.u32 %v419_v1, %v387_v0  ;;  %v389_v4 = vld [vmem:[#allocation4 + $0xb4] sm:$0xf0]  ;;  %v395_v5 = vld [vmem:[#allocation4 + $0xb0] sm:$0xf] }
  0x10   :  { %v420_v6 = vld [vmem:[#allocation4 + $0xb8] sm:$0xf0]  ;;  %v392_v7 = vor.u32 %v418_v2, %v389_v4  ;;  %v375_v9 = vld [vmem:[#allocation4 + $0x90] sm:$0xf]  ;;  %v415_v11 = vld [vmem:[#allocation4 + $0x94] sm:$0xf] }
  0x11   :  { %v396_v8 = vor.u32 %v420_v6, %v395_v5  ;;  %v416_v10 = vld [vmem:[#allocation4 + $0x98] sm:$0xf0]  ;;  %233 = vmatpush.bf16.msra.mxu0 %v388_v3  ;;  %v377_v13 = vld [vmem:[#allocation4 + $0x9c] sm:$0xf0]  ;;  %v383_v14 = vld [vmem:[#allocation4 + $0x98] sm:$0xf] }
  0x12   :  { %v376_v12 = vor.u32 %v416_v10, %v375_v9  ;;  %v417_v15 = vld [vmem:[#allocation4 + $0xa0] sm:$0xf0]  ;;  %247 = vmatpush.bf16.msra.mxu1 %v392_v7  ;;  %v380_v16 = vor.u32 %v415_v11, %v377_v13  ;;  %v363_v18 = vld [vmem:[#allocation4 + $0x78] sm:$0xf]  ;;  %v412_v20 = vld [vmem:[#allocation4 + $0x7c] sm:$0xf] }
  0x13   :  { %261 = vmatpush.bf16.msra.mxu2 %v396_v8  ;;  %v384_v17 = vor.u32 %v417_v15, %v383_v14  ;;  %v413_v19 = vld [vmem:[#allocation4 + $0x80] sm:$0xf0]  ;;  %v365_v21 = vld [vmem:[#allocation4 + $0x84] sm:$0xf0]  ;;  %v371_v22 = vld [vmem:[#allocation4 + $0x80] sm:$0xf] }
  0x14   :  { %v414_v23 = vld [vmem:[#allocation4 + $0x88] sm:$0xf0]  ;;  %v364_v24 = vor.u32 %v413_v19, %v363_v18  ;;  %v368_v25 = vor.u32 %v412_v20, %v365_v21  ;;  %v351_v27 = vld [vmem:[#allocation4 + $0x60] sm:$0xf]  ;;  %v409_v29 = vld [vmem:[#allocation4 + $0x64] sm:$0xf] }
  0x15   :  { %234 = vmatpush.bf16.msra.mxu0 %v376_v12  ;;  %v372_v26 = vor.u32 %v414_v23, %v371_v22  ;;  %v410_v28 = vld [vmem:[#allocation4 + $0x68] sm:$0xf0]  ;;  %v353_v30 = vld [vmem:[#allocation4 + $0x6c] sm:$0xf0]  ;;  %v359_v31 = vld [vmem:[#allocation4 + $0x68] sm:$0xf] }
  0x16   :  { %248 = vmatpush.bf16.msra.mxu1 %v380_v16  ;;  %v411_v32 = vld [vmem:[#allocation4 + $0x70] sm:$0xf0]  ;;  %v352_v33 = vor.u32 %v410_v28, %v351_v27  ;;  %v356_v34 = vor.u32 %v409_v29, %v353_v30  ;;  %v339_v36 = vld [vmem:[#allocation4 + $0x48] sm:$0xf]  ;;  %v406_v38 = vld [vmem:[#allocation4 + $0x4c] sm:$0xf] }
  0x17   :  { %262 = vmatpush.bf16.msra.mxu2 %v384_v17  ;;  %v360_v35 = vor.u32 %v411_v32, %v359_v31  ;;  %v407_v37 = vld [vmem:[#allocation4 + $0x50] sm:$0xf0]  ;;  %v341_v39 = vld [vmem:[#allocation4 + $0x54] sm:$0xf0]  ;;  %v347_v40 = vld [vmem:[#allocation4 + $0x50] sm:$0xf] }
  0x18   :  { %v408_v41 = vld [vmem:[#allocation4 + $0x58] sm:$0xf0]  ;;  %v340_v42 = vor.u32 %v407_v37, %v339_v36  ;;  %v344_v43 = vor.u32 %v406_v38, %v341_v39  ;;  %v327_v45 = vld [vmem:[#allocation4 + $0x30] sm:$0xf]  ;;  %v403_v47 = vld [vmem:[#allocation4 + $0x34] sm:$0xf] }
  0x19   :  { %235 = vmatpush.bf16.msra.mxu0 %v364_v24  ;;  %v348_v44 = vor.u32 %v408_v41, %v347_v40  ;;  %v404_v46 = vld [vmem:[#allocation4 + $0x38] sm:$0xf0]  ;;  %v329_v48 = vld [vmem:[#allocation4 + $0x3c] sm:$0xf0]  ;;  %v335_v49 = vld [vmem:[#allocation4 + $0x38] sm:$0xf] }
  0x1a   :  { %249 = vmatpush.bf16.msra.mxu1 %v368_v25  ;;  %v405_v50 = vld [vmem:[#allocation4 + $0x40] sm:$0xf0]  ;;  %v328_v51 = vor.u32 %v404_v46, %v327_v45  ;;  %v332_v52 = vor.u32 %v403_v47, %v329_v48  ;;  %v315_v54 = vld [vmem:[#allocation4 + $0x18] sm:$0xf]  ;;  %v400_v56 = vld [vmem:[#allocation4 + $0x1c] sm:$0xf] }
  0x1b   :  { %263 = vmatpush.bf16.msra.mxu2 %v372_v26  ;;  %v336_v53 = vor.u32 %v405_v50, %v335_v49  ;;  %v401_v55 = vld [vmem:[#allocation4 + $0x20] sm:$0xf0]  ;;  %v317_v57 = vld [vmem:[#allocation4 + $0x24] sm:$0xf0]  ;;  %v323_v58 = vld [vmem:[#allocation4 + $0x20] sm:$0xf] }
  0x1c   :  { %v402_v59 = vld [vmem:[#allocation4 + $0x28] sm:$0xf0]  ;;  %v316_v60 = vor.u32 %v401_v55, %v315_v54  ;;  %v320_v61 = vor.u32 %v400_v56, %v317_v57  ;;  %v303_v63 = vld [vmem:[#allocation4] sm:$0xf]  ;;  %v397_v1 = vld [vmem:[#allocation4 + $0x4] sm:$0xf] }
  0x1d   :  { %236 = vmatpush.bf16.msra.mxu0 %v352_v33  ;;  %v324_v62 = vor.u32 %v402_v59, %v323_v58  ;;  %v398_v0 = vld [vmem:[#allocation4 + $0x8] sm:$0xf0]  ;;  %v305_v2 = vld [vmem:[#allocation4 + $0xc] sm:$0xf0]  ;;  %v311_v3 = vld [vmem:[#allocation4 + $0x8] sm:$0xf] }
  0x1e   :  { %250 = vmatpush.bf16.msra.mxu1 %v356_v34  ;;  %v399_v4 = vld [vmem:[#allocation4 + $0x10] sm:$0xf0]  ;;  %v304_v5 = vor.u32 %v398_v0, %v303_v63  ;;  %v63_v7 = vld [vmem:[#allocation2 + $0x8] sm:$0xff]  ;;  %v308_v8 = vor.u32 %v397_v1, %v305_v2  ;;  %v97_v13 = vld [vmem:[#allocation6] sm:$0x7] }
  0x1f   :  { %264 = vmatpush.bf16.msra.mxu2 %v360_v35  ;;  %v62_v6 = vld [vmem:[#allocation2] sm:$0xff]  ;;  %v312_v9 = vor.u32 %v399_v4, %v311_v3  ;;  %v99_v14 = vperm.slane %v97_v13, 0  ;;  %v100_v15 = vperm.slane %v97_v13, 1  ;;  %v101_v24 = vperm.slane %v97_v13, 2 }
  0x20   :  { %v64_v10 = vpack.c.bf16 %v63_v7, %v62_v6 }
  0x21   :  { %237 = vmatpush.bf16.msra.mxu0 %v340_v42 }
  0x22   :  { %251 = vmatpush.bf16.msra.mxu1 %v344_v43 }
  0x23   :  { %265 = vmatpush.bf16.msra.mxu2 %v348_v44 }
  0x25   :  { %238 = vmatpush.bf16.msra.mxu0 %v328_v51 }
  0x26   :  { %252 = vmatpush.bf16.msra.mxu1 %v332_v52 }
  0x27   :  { %266 = vmatpush.bf16.msra.mxu2 %v336_v53 }
  0x29   :  { %239 = vmatpush.bf16.msra.mxu0 %v316_v60 }
  0x2a   :  { %253 = vmatpush.bf16.msra.mxu1 %v320_v61 }
  0x2b   :  { %267 = vmatpush.bf16.msra.mxu2 %v324_v62 }
  0x2d   :  { %240 = vmatpush.bf16.msra.mxu0 %v304_v5 }
  0x2e   :  { %254 = vmatpush.bf16.msra.mxu1 %v308_v8 }
  0x2f   :  { %268 = vmatpush.bf16.msra.mxu2 %v312_v9 }
  0x30   :  { %241 = vmatmul.bf16.vlgmr.msra.gmra.mxu0 %v64_v10 }
  0x31   :  { %255 = vmatmul.bf16.vlgmr.msra.gmra.mxu1 %v64_v10 }
  0x32   :  { %269 = vmatmul.bf16.vlgmr.msra.gmra.mxu2 %v64_v10 }
  0xad   :  { %v242_v11 = vpop.f32.mrf.mxu0 }
  0xae   :  { %v256_v12 = vpop.f32.mrf.mxu1  ;;  %v243_v18 = vadd.f32 %v242_v11, %v99_v14 }
  0xaf   :  { %v257_v21 = vadd.f32 %v256_v12, %v100_v15 }
  0xb5   :  { %v270_v16 = vpop.f32.mrf.mxu2  ;;  %v244_v17 = vpop.f32.mrf.mxu0 }
  0xb6   :  { %v245_v19 = vadd.f32 %v244_v17, %v99_v14  ;;  %v258_v20 = vpop.f32.mrf.mxu1  ;;  %v271_v27 = vadd.f32 %v270_v16, %v101_v24 }
  0xb7   :  { %v259_v22 = vadd.f32 %v258_v20, %v100_v15 }
  0xb8   :  { %v424_v23 = vpack.c.bf16 %v245_v19, %v243_v18 }
  0xb9   :  { %v429_v25 = vpack.c.bf16 %v259_v22, %v257_v21 }
  0xba   :  { %425 = vst [vmem:[%s577_s3] sm:$0xff] %v424_v23  }
  0xbb   :  { %430 = vst [vmem:[%s578_s4] sm:$0xff] %v429_v25  }
  0xbd   :  { %v272_v26 = vpop.f32.mrf.mxu2 }
  0xbe   :  { %v273_v28 = vadd.f32 %v272_v26, %v101_v24 }
  0xc0   :  { %v434_v29 = vpack.c.bf16 %v273_v28, %v271_v27 }
  0xc2   :  { %435 = vst [vmem:[%s579_s5] sm:$0xff] %v434_v29  }
  0xc3   :  { %299 = vsyncpa [#allocation3], 1 }
  0xc4   :  { %300 = vsyncpa [#allocation5], 1 }

// kernel: bert_self_attention.3
= control target key start
LH: loop header
LB: loop body
LE: loop exit
PB: predicated region body
PF: predicated region fallthrough
CT: control target
= control target key end

     0   :  { %s691_s12 = smov 0   ;;  %s693_s13 = smov 0   ;;  %s776_s0 = inlined_call_operand.vmem [shape: bf16[2,8,128], index: 0, kind: input, shape index: {}]   ;;  %s777_s1 = inlined_call_operand.vmem [shape: bf16[2,8,128], index: 1, kind: input, shape index: {}]   ;;  %s778_s2 = inlined_call_operand.vmem [shape: bf16[2,8,128], index: 2, kind: input, shape index: {}]   ;;  %s779_s3 = inlined_call_operand.vmem [shape: bf16[2,8,128], index: 3, kind: output, shape index: {}]  }
   0x1   :  { %s695_s14 = smov 0  }
   0x2 LB: > { %s25_s15 = sadd.s32 1, %s662_s13  ;;  %p586_p0 = scmp.ge.s32.totalorder %s666_s14, 1  ;;  %s666_s14 = sphi %s695_s14, %s13_s14   ;;  %s662_s13 = sphi %s693_s13, %s781_s13   ;;  %s658_s12 = sphi %s691_s12, %s780_s12  }
   0x3   : > { %p27_p1 = scmp.ge.s32.totalorder %s25_s15, 2  ;;  %p173_p2 = scmp.lt.s32.totalorder %s666_s14, 3 }
   0x5   : > { %s783_s15 = smov (%p27_p1, %s25_s15), 0  ;;  %p174_p3 = pnand %p586_p0, %p173_p2 }
   0x6   : > { %p209_p4 = scmp.lt.s32.totalorder (!%p174_p3), %s658_s12, 1  ;;  %s668_s23 = smov (!%p174_p3), 96  }
   0x7   : > { %177 = sbr.rel (%p174_p3) target bundleno = 826 (0x33a), region = 32  ;;  %s669_s24 = smov (!%p174_p3), 32  }
   0x8   : > { %s670_s25 = smov (!%p174_p3), 64  }
   0xc   : > { %s785_s12 = smov (!%p209_p4, %s658_s12), 1  ;;  %vm235_vm0 = vcmask 261120   ;;  %vm255_vm1 = vcmask 64512   ;;  %vm269_vm2 = vcmask 1043456   ;;  %vm478_vm3 = vcmask 523264  }
   0xd   : > { %s709_s16 = sshll.u32 %s785_s12, 2  ;;  %vm480_vm4 = vcmask 785408  }
   0xe   : > { %s219_s19 = scalar_lea.vmem %s777_s1, %s709_s16  ;;  %s215_s22 = scalar_lea.vmem %s776_s0, %s709_s16 }
   0xf   : > { %v233_v0 = vld [vmem:[%s219_s19] sm:$0xf]  ;;  %s223_s28 = scalar_lea.vmem %s778_s2, %s709_s16  ;;  %s230_s4 = scalar_lea.vmem %s779_s3, %s709_s16 }
  0x10   : > { %v232_v1 = vld [vmem:[%s215_s22] sm:$0xf]  ;;  %v240_v2 = vsel %vm235_vm0, %v233_v0, 0  ;;  %v294_v3 = vunpack.c.l.b16 %v233_v0 }
  0x11   : > { %v289_v4 = vunpack.c.l.b16 %v232_v1  ;;  %249 = vmatpush.bf16.xpose.msra.mxu0 %v240_v2  ;;  %v234_v15 = vld [vmem:[%s223_s28] sm:$0xf] }
  0x12   : > { %v295_v5 = vpack.c.b16 %v294_v3, %v294_v3  ;;  %v271_v16 = vsel %vm269_vm2, %v234_v15, 0  ;;  %v328_v17 = vunpack.c.l.b16 %v234_v15 }
  0x13   : > { %v290_v6 = vpack.c.b16 %v289_v4, %v289_v4  ;;  %280 = vmatpush.bf16.msra.mxu1 %v271_v16 }
  0x14   : > { %411 = vrot.lane.b32.xlu2 %v295_v5, %s669_s24  ;;  %v329_v18 = vpack.c.b16 %v328_v17, %v328_v17 }
  0x15   : > { %291 = vrot.lane.b32.xlu1 %v290_v6, %s668_s23 }
  0x18   : > { %591 = vmatmul.msk.bf16.vlgmr.msra.gmra.mxu0 %vm235_vm0, %v232_v1 }
  0x1c   : > { %353 = vrot.lane.b32.xlu2 %v290_v6, %s670_s25 }
  0x1d   : > { %355 = vrot.lane.b32.xlu1 %v295_v5, %s670_s25 }
  0x25   : > { %409 = vrot.lane.b32.xlu1 %v290_v6, %s669_s24 }
  0x2d   : > { %330 = vrot.lane.b32.xlu1 %v329_v18, %s668_s23 }
  0x6e   : > { %v412_v8 = vpop.permute.xlu2 %411 }
  0x6f   : > { %v417_v9 = vsel %vm235_vm0, %v412_v8, 0 }
  0x70   : > { %426 = vmatpush.bf16.xpose.msrb.mxu0 %v417_v9 }
  0x76   : > { %v354_v30 = vpop.permute.xlu2 %353 }
  0x87   : > { %v292_v7 = vpop.permute.xlu1 %291 }
  0x8f   : > { %v356_v10 = vpop.permute.xlu1 %355 }
  0x90   : > { %v361_v19 = vsel %vm235_vm0, %v356_v10, 0 }
  0x91   : > { %370 = vmatpush.bf16.xpose.msrb.mxu1 %v361_v19 }
  0x95   : > { %v251_v11 = vpop.f32.mrf.mxu0 }
  0x96   : > { %v256_v12 = vsel %vm255_vm1, %v251_v11, -inf }
  0x97   : > { %257 = vmax.xlane.f32.xlu0 %v256_v12  ;;  %v410_v13 = vpop.permute.xlu1 %409 }
  0x98   : > { %597 = vmatmul.msk.bf16.vlgmr.msrb.gmra.mxu0 %vm235_vm0, %v410_v13 }
  0x9d   : > { %v253_v14 = vpop.f32.mrf.mxu0 }
  0x9f   : > { %v331_v40 = vpop.permute.xlu1 %330 }
  0xa0   : > { %v336_v41 = vsel %vm269_vm2, %v331_v40, 0 }
  0xa1   : > { %345 = vmatpush.bf16.msra.mxu3 %v336_v41 }
  0xab   : > { %296 = vrot.lane.b32.xlu0 %v295_v5, %s668_s23 }
 0x10a   : > { %v258_v20 = vpop.xlane.xlu0 %257 }
 0x10b   : > { %v259_v21 = vsub.f32 %v251_v11, %v258_v20 }
 0x10d   : > { %v260_v22 = vmul.f32 1.442695, %v259_v21 }
 0x10f   : > { %628 = vpow2.f32 %v260_v22 }
 0x115   : > { %v629_v23 = vpop.eup %628  ;;  %v428_v25 = vpop.f32.mrf.mxu0 }
 0x116   : > { %v265_v24 = vpack.c.bf16 %v629_v23, %v629_v23  ;;  %v432_v26 = vsel %vm255_vm1, %v428_v25, -inf  ;;  %v262_v39 = vsel %vm255_vm1, %v629_v23, 0.0 }
 0x117   : > { %433 = vmax.xlane.f32.xlu1 %v432_v26 }
 0x118   : > { %592 = vmatmul.msk.bf16.vlgmr.msra.gmra.mxu1 %vm255_vm1, %v265_v24 }
 0x11d   : > { %v297_v27 = vpop.permute.xlu0 %296  ;;  %v430_v29 = vpop.f32.mrf.mxu0 }
 0x11e   : > { %v302_v28 = vsel %vm235_vm0, %v297_v27, 0 }
 0x11f   : > { %311 = vmatpush.bf16.xpose.msra.mxu2 %v302_v28 }
 0x126   : > { %593 = vmatmul.msk.bf16.vlgmr.msra.gmra.mxu2 %vm235_vm0, %v292_v7 }
 0x128   : > { %595 = vmatmul.msk.bf16.vlgmr.msrb.gmra.mxu1 %vm235_vm0, %v354_v30 }
 0x18a   : > { %v434_v44 = vpop.xlane.xlu1 %433 }
 0x18b   : > { %v435_v47 = vsub.f32 %v428_v25, %v434_v44 }
 0x18d   : > { %v436_v50 = vmul.f32 1.442695, %v435_v47 }
 0x195   : > { %v742_v31 = vpop.f32.mrf.mxu1 }
 0x19d   : > { %v284_v32 = vpop.f32.mrf.mxu1 }
 0x1a5   : > { %v372_v33 = vpop.f32.mrf.mxu1 }
 0x1a6   : > { %v376_v34 = vsel %vm255_vm1, %v372_v33, -inf }
 0x1a7   : > { %377 = vmax.xlane.f32.xlu0 %v376_v34 }
 0x1a9   : > { %v313_v35 = vpop.f32.mrf.mxu2 }
 0x1aa   : > { %v317_v36 = vsel %vm255_vm1, %v313_v35, -inf }
 0x1ab   : > { %318 = vmax.xlane.f32.xlu2 %v317_v36 }
 0x1ad   : > { %v374_v37 = vpop.f32.mrf.mxu1 }
 0x1b1   : > { %v315_v38 = vpop.f32.mrf.mxu2 }
 0x1bb   : > { %442 = vrot.lane.b32.xlu0 %v329_v18, %s669_s24 }
 0x1c3   : > { %386 = vrot.lane.b32.xlu2 %v329_v18, %s670_s25 }
 0x1e5   : > { %263 = vadd.xlane.f32.xlu0 %v262_v39 }
 0x21a   : > { %v378_v42 = vpop.xlane.xlu0 %377 }
 0x21b   : > { %v379_v43 = vsub.f32 %v372_v33, %v378_v42 }
 0x21d   : > { %v380_v45 = vmul.f32 1.442695, %v379_v43 }
 0x21e   : > { %v319_v46 = vpop.xlane.xlu2 %318 }
 0x21f   : > { %630 = vpow2.f32 %v380_v45  ;;  %v320_v48 = vsub.f32 %v313_v35, %v319_v46 }
 0x221   : > { %v321_v49 = vmul.f32 1.442695, %v320_v48 }
 0x223   : > { %632 = vpow2.f32 %v321_v49 }
 0x224   : > { %634 = vpow2.f32 %v436_v50 }
 0x225   : > { %v631_v51 = vpop.eup %630 }
 0x226   : > { %v382_v52 = vsel %vm255_vm1, %v631_v51, 0.0  ;;  %v387_v53 = vpop.permute.xlu2 %386  ;;  %v385_v63 = vpack.c.bf16 %v631_v51, %v631_v51 }
 0x227   : > { %383 = vadd.xlane.f32.xlu2 %v382_v52  ;;  %v392_v54 = vsel %vm269_vm2, %v387_v53, 0 }
 0x228   : > { %401 = vmatpush.bf16.msrb.mxu3 %v392_v54 }
 0x229   : > { %v633_v55 = vpop.eup %632 }
 0x22a   : > { %v323_v56 = vsel %vm255_vm1, %v633_v55, 0.0  ;;  %v326_v57 = vpack.c.bf16 %v633_v55, %v633_v55  ;;  %v635_v58 = vpop.eup %634 }
 0x22b   : > { %324 = vadd.xlane.f32.xlu1 %v323_v56  ;;  %v441_v61 = vpack.c.bf16 %v635_v58, %v635_v58  ;;  %v438_v62 = vsel %vm255_vm1, %v635_v58, 0.0 }
 0x22c   : > { %594 = vmatmul.msk.bf16.vlgmr.msra.gmra.mxu3 %vm255_vm1, %v326_v57 }
 0x22d   : > { %v443_v59 = vpop.permute.xlu0 %442 }
 0x22e   : > { %v448_v60 = vsel %vm269_vm2, %v443_v59, 0 }
 0x22f   : > { %457 = vmatpush.bf16.msrb.mxu2 %v448_v60 }
 0x232   : > { %598 = vmatmul.msk.bf16.vlgmr.msrb.gmra.mxu2 %vm255_vm1, %v441_v61 }
 0x233   : > { %439 = vadd.xlane.f32.xlu1 %v438_v62 }
 0x23c   : > { %596 = vmatmul.msk.bf16.vlgmr.msrb.gmra.mxu3 %vm255_vm1, %v385_v63 }
 0x258   : > { %v264_v15 = vpop.xlane.xlu0 %263 }
 0x29a   : > { %v384_v7 = vpop.xlane.xlu2 %383 }
 0x29e   : > { %v325_v0 = vpop.xlane.xlu1 %324 }
 0x29f   : > { %636 = vrcp.f32 %v325_v0 }
 0x2a5   : > { %v637_v2 = vpop.eup %636 }
 0x2a6   : > { %v440_v1 = vpop.xlane.xlu1 %439 }
 0x2a7   : > { %638 = vrcp.f32 %v440_v1 }
 0x2a8   : > { %640 = vrcp.f32 %v384_v7 }
 0x2a9   : > { %642 = vrcp.f32 %v264_v15 }
 0x2ad   : > { %v639_v5 = vpop.eup %638 }
 0x2ae   : > { %v641_v11 = vpop.eup %640 }
 0x2af   : > { %v347_v3 = vpop.f32.mrf.mxu3  ;;  %v643_v17 = vpop.eup %642 }
 0x2b0   : > { %v352_v4 = vmul.f32 %v637_v2, %v347_v3  ;;  %v287_v18 = vmul.f32 %v643_v17, %v742_v31 }
 0x2b2   : > { %466 = vrot.lane.b32.xlu1 %v352_v4, %s669_s24 }
 0x2b5   : > { %v459_v6 = vpop.f32.mrf.mxu2 }
 0x2b6   : > { %v464_v8 = vmul.f32 %v639_v5, %v459_v6 }
 0x2b7   : > { %v349_v9 = vpop.f32.mrf.mxu3 }
 0x2b8   : > { %474 = vrot.lane.b32.xlu2 %v464_v8, %s668_s23 }
 0x2bd   : > { %v461_v10 = vpop.f32.mrf.mxu2 }
 0x2bf   : > { %v403_v12 = vpop.f32.mrf.mxu3 }
 0x2c0   : > { %v408_v13 = vmul.f32 %v641_v11, %v403_v12 }
 0x2c2   : > { %470 = vrot.lane.b32.xlu1 %v408_v13, %s670_s25 }
 0x2c7   : > { %v405_v14 = vpop.f32.mrf.mxu3 }
 0x312   : > { %v475_v21 = vpop.permute.xlu2 %474 }
 0x324   : > { %v467_v16 = vpop.permute.xlu1 %466 }
 0x325   : > { %v477_v19 = vsel %vm235_vm0, %v287_v18, %v467_v16 }
 0x334   : > { %v471_v20 = vpop.permute.xlu1 %470 }
 0x335   : > { %v479_v22 = vsel %vm478_vm3, %v477_v19, %v471_v20 }
 0x336   : > { %v481_v23 = vsel %vm480_vm4, %v479_v22, %v475_v21 }
 0x337   : > { %v482_v24 = vpack.c.bf16 %v481_v23, %v481_v23 }
 0x339   : > { %483 = vst [vmem:[%s230_s4] sm:$0xf] %v482_v24 }
 0x33a PF: > { %s13_s14 = sadd.s32 1, %s666_s14   ;;  %s780_s12 = smov %s662_s13 }
 0x33b   : > { %p10_p5 = scmp.ge.s32.totalorder %s13_s14, 4   ;;  %s781_s13 = smov %s783_s15 }
 0x33d   :  { %12 = sbr.rel (!%p10_p5) target bundleno = 2 (0x2), region = 68 }

</bundles_post_ra>
